<compile_context>
chip_gen: v7x
topology: tpu7x:2x2x1
jax: 0.10.0
libtpu: 0.0.40
codegen_flags: <defaults>
</compile_context>

<pallas_src>
import functools
import math

import jax
import jax.numpy as jnp
from jax.experimental import pallas as pl
from jax.experimental.pallas import tpu as pltpu


# ------------------------------ tiling helpers --------------------------------

def _choose_tile(total, preferred, multiple):
    """Largest tile <= preferred that divides `total` and is a multiple of
    `multiple`; falls back to the full dimension (always TPU-legal)."""
    if total <= preferred:
        return total
    if total % multiple != 0:
        return total
    t = (preferred // multiple) * multiple
    while t >= multiple:
        if total % t == 0:
            return t
        t -= multiple
    return total


# ----------------------------- Pallas kernels -------------------------------

def _rmsnorm_matmul_kernel(x_ref, g_ref, w_ref, o_ref, *, eps):
    x = x_ref[...]                                        # (tm, D) f32
    ms = jnp.mean(x * x, axis=-1, keepdims=True)
    xn = x * jax.lax.rsqrt(ms + eps) * g_ref[...]
    o_ref[...] = jnp.dot(xn, w_ref[...], preferred_element_type=jnp.float32)


def rmsnorm_matmul_pallas(x2d, g, w, eps):
    """Fused RMSNorm + matmul: y = (rmsnorm(x) * g) @ W, tiled over (M, N)."""
    M, D = x2d.shape
    N = w.shape[1]
    tm = _choose_tile(M, 256, 8)
    tn = _choose_tile(N, 512, 128)
    grid = (M // tm, N // tn)
    return pl.pallas_call(
        functools.partial(_rmsnorm_matmul_kernel, eps=eps),
        out_shape=jax.ShapeDtypeStruct((M, N), jnp.float32),
        grid=grid,
        in_specs=[pl.BlockSpec((tm, D), lambda i, j: (i, 0)),
                  pl.BlockSpec((1, D), lambda i, j: (0, 0)),
                  pl.BlockSpec((D, tn), lambda i, j: (0, j))],
        out_specs=pl.BlockSpec((tm, tn), lambda i, j: (i, j)),
        compiler_params=pltpu.CompilerParams(
            dimension_semantics=("parallel", "parallel")),
    )(x2d, g.reshape(1, D), w)


def _matmul_residual_kernel(x_ref, w_ref, res_ref, o_ref, acc_ref):
    @pl.when(pl.program_id(2) == 0)
    def _():
        acc_ref[...] = jnp.zeros(acc_ref.shape, acc_ref.dtype)

    acc_ref[...] += jnp.dot(x_ref[...], w_ref[...],
                            preferred_element_type=jnp.float32)

    @pl.when(pl.program_id(2) == pl.num_programs(2) - 1)
    def _():
        o_ref[...] = (acc_ref[...] + res_ref[...]).astype(o_ref.dtype)


def matmul_residual_pallas(x2d, w, res2d):
    """y = res + x @ W, tiled over (M, N, K) with a VMEM accumulator."""
    M, K = x2d.shape
    K2, N = w.shape
    assert K == K2 and res2d.shape == (M, N)
    tm = _choose_tile(M, 256, 8)
    tn = _choose_tile(N, 512, 128)
    tk = _choose_tile(K, 512, 128)
    grid = (M // tm, N // tn, K // tk)
    return pl.pallas_call(
        _matmul_residual_kernel,
        out_shape=jax.ShapeDtypeStruct((M, N), jnp.float32),
        grid=grid,
        in_specs=[pl.BlockSpec((tm, tk), lambda i, j, k: (i, k)),
                  pl.BlockSpec((tk, tn), lambda i, j, k: (k, j)),
                  pl.BlockSpec((tm, tn), lambda i, j, k: (i, j))],
        out_specs=pl.BlockSpec((tm, tn), lambda i, j, k: (i, j)),
        scratch_shapes=[pltpu.VMEM((tm, tn), jnp.float32)],
        compiler_params=pltpu.CompilerParams(
            dimension_semantics=("parallel", "parallel", "arbitrary")),
    )(x2d, w, res2d)


def _attn_kernel(q_ref, k_ref, v_ref, o_ref, m_sc, l_sc, acc_sc,
                 *, scale, start_pos, tq, tkv):
    qi = pl.program_id(2)
    ki = pl.program_id(3)

    @pl.when(ki == 0)
    def _():
        m_sc[...] = jnp.full(m_sc.shape, -jnp.inf, m_sc.dtype)
        l_sc[...] = jnp.zeros(l_sc.shape, l_sc.dtype)
        acc_sc[...] = jnp.zeros(acc_sc.shape, acc_sc.dtype)

    q_start = start_pos + qi * tq

    # Skip KV blocks that lie entirely in the causal future of this q block
    # (their contribution is exactly zero).  KV block 0 is never skipped, so
    # -inf online-softmax math stays NaN-free.
    @pl.when(ki * tkv <= q_start + tq - 1)
    def _():
        q = q_ref[0, 0] * scale                           # fold scale into Q
        k = k_ref[0, 0]                                   # (tkv, Dh)
        v = v_ref[0, 0]                                   # (tkv, Dh)

        # QK^T by contracting the last dims directly (no in-kernel transpose).
        s = jax.lax.dot_general(q, k, (((1,), (1,)), ((), ())),
                                preferred_element_type=jnp.float32)

        # Causal mask synthesized in-kernel: kv_pos <= start_pos + q_pos.
        q_pos = q_start + jax.lax.broadcasted_iota(jnp.int32, (tq, tkv), 0)
        kv_pos = ki * tkv + jax.lax.broadcasted_iota(jnp.int32, (tq, tkv), 1)
        s = jnp.where(kv_pos <= q_pos, s, -jnp.inf)

        # Online-softmax (flash) update.
        m_prev = m_sc[...]
        m_new = jnp.maximum(m_prev, jnp.max(s, axis=-1, keepdims=True))
        alpha = jnp.exp(m_prev - m_new)
        p = jnp.exp(s - m_new)
        l_sc[...] = alpha * l_sc[...] + jnp.sum(p, axis=-1, keepdims=True)
        acc_sc[...] = alpha * acc_sc[...] + jnp.dot(
            p, v, preferred_element_type=jnp.float32)
        m_sc[...] = m_new

    @pl.when(ki == pl.num_programs(3) - 1)
    def _():
        o_ref[0, 0] = (acc_sc[...] *
                       pl.reciprocal(l_sc[...], approx=True)).astype(o_ref.dtype)


def attention_pallas(q, k, v, start_pos, scale):
    # q: (B, H, S, Dh), k/v: (B, KH, Skv, Dh); GQA via index_map (h // n_rep).
    B, H, S, Dh = q.shape
    KH, Skv = k.shape[1], k.shape[2]
    n_rep = H // KH
    tq = _choose_tile(S, 256, 8)
    tkv = _choose_tile(Skv, 512, 8)
    grid = (B, H, S // tq, Skv // tkv)
    kernel = functools.partial(_attn_kernel, scale=scale, start_pos=start_pos,
                               tq=tq, tkv=tkv)
    kv_map = lambda b, h, qi, ki: (b, h // n_rep, ki, 0)
    return pl.pallas_call(
        kernel,
        out_shape=jax.ShapeDtypeStruct((B, H, S, Dh), jnp.float32),
        grid=grid,
        in_specs=[pl.BlockSpec((1, 1, tq, Dh), lambda b, h, qi, ki: (b, h, qi, 0)),
                  pl.BlockSpec((1, 1, tkv, Dh), kv_map),
                  pl.BlockSpec((1, 1, tkv, Dh), kv_map)],
        out_specs=pl.BlockSpec((1, 1, tq, Dh), lambda b, h, qi, ki: (b, h, qi, 0)),
        scratch_shapes=[pltpu.VMEM((tq, 1), jnp.float32),
                        pltpu.VMEM((tq, 1), jnp.float32),
                        pltpu.VMEM((tq, Dh), jnp.float32)],
        compiler_params=pltpu.CompilerParams(
            dimension_semantics=("parallel", "parallel", "parallel", "arbitrary")),
    )(q, k, v)


def _ffn_kernel(x_ref, g_ref, w1_ref, w3_ref, w2_ref, o_ref, acc_ref, *, eps):
    @pl.when(pl.program_id(1) == 0)
    def _():
        acc_ref[...] = jnp.zeros(acc_ref.shape, acc_ref.dtype)

    x = x_ref[...]                                        # (tm, D)
    ms = jnp.mean(x * x, axis=-1, keepdims=True)
    xn = x * jax.lax.rsqrt(ms + eps) * g_ref[...]         # fused ffn_norm
    h1 = jnp.dot(xn, w1_ref[...], preferred_element_type=jnp.float32)
    h3 = jnp.dot(xn, w3_ref[...], preferred_element_type=jnp.float32)
    acc_ref[...] += jnp.dot((h1 * jax.nn.sigmoid(h1)) * h3, w2_ref[...],
                            preferred_element_type=jnp.float32)

    @pl.when(pl.program_id(1) == pl.num_programs(1) - 1)
    def _():
        # Residual fused at finalize: output block is x + FFN(rmsnorm(x)).
        o_ref[...] = (acc_ref[...] + x).astype(o_ref.dtype)


def ffn_pallas(x2d, g, w1, w3, w2, eps):
    """Fused ffn_norm + SwiGLU FFN + residual, tiled over rows and hidden dim."""
    M, D = x2d.shape
    Hf = w1.shape[1]
    tm = _choose_tile(M, 256, 8)
    th = _choose_tile(Hf, 512, 128)
    grid = (M // tm, Hf // th)
    return pl.pallas_call(
        functools.partial(_ffn_kernel, eps=eps),
        out_shape=jax.ShapeDtypeStruct((M, D), jnp.float32),
        grid=grid,
        in_specs=[pl.BlockSpec((tm, D), lambda i, h: (i, 0)),
                  pl.BlockSpec((1, D), lambda i, h: (0, 0)),
                  pl.BlockSpec((D, th), lambda i, h: (0, h)),
                  pl.BlockSpec((D, th), lambda i, h: (0, h)),
                  pl.BlockSpec((th, D), lambda i, h: (h, 0))],
        out_specs=pl.BlockSpec((tm, D), lambda i, h: (i, 0)),
        scratch_shapes=[pltpu.VMEM((tm, D), jnp.float32)],
        compiler_params=pltpu.CompilerParams(
            dimension_semantics=("parallel", "arbitrary")),
    )(x2d, g.reshape(1, D), w1, w3, w2)


PALLAS_OPS = dict(rmsnorm_matmul=rmsnorm_matmul_pallas,
                  matmul_residual=matmul_residual_pallas,
                  attention=attention_pallas, ffn=ffn_pallas)


# --------------------------- pure-JAX reference ops --------------------------

_HI = jax.lax.Precision.HIGHEST


def _rmsnorm_matmul_ref(x2d, g, w, eps):
    ms = jnp.mean(x2d * x2d, axis=-1, keepdims=True)
    xn = x2d * jax.lax.rsqrt(ms + eps) * g[None, :]
    return jnp.dot(xn, w, precision=_HI)


def _matmul_residual_ref(x2d, w, res2d):
    return res2d + jnp.dot(x2d, w, precision=_HI)


def _attention_ref(q, k, v, start_pos, scale):
    B, H, S, Dh = q.shape
    KH, Skv = k.shape[1], k.shape[2]
    n_rep = H // KH
    k = jnp.repeat(k, n_rep, axis=1)
    v = jnp.repeat(v, n_rep, axis=1)
    s = jnp.einsum("bhqd,bhkd->bhqk", q, k, precision=_HI) * scale
    q_pos = start_pos + jnp.arange(S)[:, None]
    kv_pos = jnp.arange(Skv)[None, :]
    s = jnp.where(kv_pos <= q_pos, s, -jnp.inf)
    p = jax.nn.softmax(s, axis=-1)
    return jnp.einsum("bhqk,bhkd->bhqd", p, v, precision=_HI)


def _ffn_ref(x2d, g, w1, w3, w2, eps):
    ms = jnp.mean(x2d * x2d, axis=-1, keepdims=True)
    xn = x2d * jax.lax.rsqrt(ms + eps) * g[None, :]
    h1 = jnp.dot(xn, w1, precision=_HI)
    h3 = jnp.dot(xn, w3, precision=_HI)
    return x2d + jnp.dot((h1 * jax.nn.sigmoid(h1)) * h3, w2, precision=_HI)


REF_OPS = dict(rmsnorm_matmul=_rmsnorm_matmul_ref,
               matmul_residual=_matmul_residual_ref,
               attention=_attention_ref, ffn=_ffn_ref)


# ------------------------------- model glue ----------------------------------

def apply_rotary_emb(xq, xk, cos, sin):
    # xq: (B,S,H,Dh), xk: (B,S,KH,Dh); cos/sin: (S, Dh//2)
    def rot(x):
        B, S, H, Dh = x.shape
        xr = x.reshape(B, S, H, Dh // 2, 2)
        xa, xb = xr[..., 0], xr[..., 1]
        c = cos[None, :, None, :]
        s = sin[None, :, None, :]
        oa = xa * c - xb * s
        ob = xa * s + xb * c
        return jnp.stack([oa, ob], axis=-1).reshape(B, S, H, Dh)
    return rot(xq), rot(xk)


def transformer_block(lp, x, start_pos, cos, sin, cfg, ops):
    B, S, D = x.shape
    H, KH = cfg["n_heads"], cfg["n_kv_heads"]
    Dh = D // H

    # Fused attention_norm + (wq|wk|wv) projection.
    xqkv = ops["rmsnorm_matmul"](x.reshape(B * S, D), lp["attn_norm_w"],
                                 lp["wqkv"], cfg["norm_eps"])
    q_sz, kv_sz = H * Dh, KH * Dh
    xq = xqkv[:, :q_sz].reshape(B, S, H, Dh)
    xk = xqkv[:, q_sz:q_sz + kv_sz].reshape(B, S, KH, Dh)
    xv = xqkv[:, q_sz + kv_sz:].reshape(B, S, KH, Dh)
    xq, xk = apply_rotary_emb(xq, xk, cos, sin)

    # KV cache (functional mirror of the torch in-place cache writes).
    cache_k = lp["cache_k"].at[:B, start_pos:start_pos + S].set(xk)
    cache_v = lp["cache_v"].at[:B, start_pos:start_pos + S].set(xv)
    lp["cache_k"], lp["cache_v"] = cache_k, cache_v
    keys = cache_k[:B, :start_pos + S]                    # (B, Skv, KH, Dh)
    values = cache_v[:B, :start_pos + S]

    q = xq.transpose(0, 2, 1, 3)                          # (B, H, S, Dh)
    k = keys.transpose(0, 2, 1, 3)                        # (B, KH, Skv, Dh)
    v = values.transpose(0, 2, 1, 3)

    attn = ops["attention"](q, k, v, start_pos, 1.0 / math.sqrt(Dh))
    attn = attn.transpose(0, 2, 1, 3).reshape(B * S, H * Dh)

    # wo projection with the residual add fused into the matmul finalize.
    h = ops["matmul_residual"](attn, lp["wo"], x.reshape(B * S, D)).reshape(B, S, D)

    # Fused ffn_norm + SwiGLU FFN + residual.
    out = ops["ffn"](h.reshape(B * S, D), lp["ffn_norm_w"],
                     lp["w1"], lp["w3"], lp["w2"], cfg["norm_eps"])
    return out.reshape(B, S, D)


def transformer_forward(params, tokens, start_pos, cfg, ops):
    B, S = tokens.shape
    D, V = cfg["dim"], cfg["vocab_size"]
    h = params["tok_embeddings"][tokens]                  # embedding gather (glue)
    cos = params["freqs_cos"][start_pos:start_pos + S]
    sin = params["freqs_sin"][start_pos:start_pos + S]

    # Causal mask is generated inside the attention kernel (iota compare),
    # correct for any start_pos (prefill and decode).
    for lp in params["layers"]:
        h = transformer_block(lp, h, start_pos, cos, sin, cfg, ops)

    # Final RMSNorm fused into the output-head matmul (tiled over vocab).
    logits = ops["rmsnorm_matmul"](h.reshape(B * S, D), params["norm_w"],
                                   params["output_w"], cfg["norm_eps"])
    return logits.reshape(B, S, V).astype(jnp.float32)


# ------------------------------- parameter init -------------------------------

def init_params(key, cfg):
    D, H, KH = cfg["dim"], cfg["n_heads"], cfg["n_kv_heads"]
    Dh = D // H
    V = cfg["vocab_size"]

    hidden = 4 * D
    hidden = int(2 * hidden / 3)
    if cfg["ffn_dim_multiplier"] is not None:
        hidden = int(cfg["ffn_dim_multiplier"] * hidden)
    mo = cfg["multiple_of"]
    hidden = mo * ((hidden + mo - 1) // mo)
    cfg["ffn_hidden"] = hidden

    keys = jax.random.split(key, 2 + cfg["n_layers"])

    def lin(k, shape):
        return (0.05 * jax.random.normal(k, shape)).astype(jnp.float32)

    params = {
        "tok_embeddings": lin(keys[0], (V, D)),
        "output_w": lin(keys[1], (D, V)),
        "norm_w": jnp.ones((D,), jnp.float32),
        "layers": [],
    }
    for li in range(cfg["n_layers"]):
        ks = jax.random.split(keys[2 + li], 7)
        wq = lin(ks[0], (D, H * Dh))
        wk = lin(ks[1], (D, KH * Dh))
        wv = lin(ks[2], (D, KH * Dh))
        params["layers"].append(dict(
            wqkv=jnp.concatenate([wq, wk, wv], axis=1),   # fused QKV weight
            wo=lin(ks[3], (H * Dh, D)),
            w1=lin(ks[4], (D, hidden)),
            w3=lin(ks[5], (D, hidden)),
            w2=lin(ks[6], (hidden, D)),
            attn_norm_w=jnp.ones((D,), jnp.float32),
            ffn_norm_w=jnp.ones((D,), jnp.float32),
            cache_k=jnp.zeros((cfg["max_batch_size"], cfg["max_seq_len"], KH, Dh),
                              jnp.float32),
            cache_v=jnp.zeros((cfg["max_batch_size"], cfg["max_seq_len"], KH, Dh),
                              jnp.float32),
        ))

    # precompute_freqs_cis(dim=head_dim, end=max_seq_len*2)
    t = jnp.arange(cfg["max_seq_len"] * 2, dtype=jnp.float32)
    freqs = 1.0 / (10000.0 ** (jnp.arange(0, Dh, 2)[: Dh // 2].astype(jnp.float32) / Dh))
    angles = jnp.outer(t, freqs)
    params["freqs_cos"] = jnp.cos(angles)
    params["freqs_sin"] = jnp.sin(angles)
    return params


# ----------------------------------- main -------------------------------------

if __name__ == "__main__":
    cfg = dict(dim=64, n_layers=2, n_heads=4, n_kv_heads=2, vocab_size=64,
               multiple_of=32, ffn_dim_multiplier=None, norm_eps=1e-5,
               max_batch_size=4, max_seq_len=16)

    root = jax.random.PRNGKey(0)
    k_params, k_tok = jax.random.split(root)
    params = init_params(k_params, cfg)

    B, S, start_pos = 2, 8, 0
    tokens = jax.random.randint(k_tok, (B, S), 0, cfg["vocab_size"], dtype=jnp.int32)

    logits = transformer_forward(params, tokens, start_pos, cfg, PALLAS_OPS)
    logits = jax.block_until_ready(logits)

    # Pure-JAX reference for the same math (same weights / same glue).
    ref = transformer_forward(params, tokens, start_pos, cfg, REF_OPS)
    ref = jax.block_until_ready(ref)

    assert logits.shape == (B, S, cfg["vocab_size"])
    assert logits.dtype == jnp.float32
    assert bool(jnp.all(jnp.isfinite(logits)))
    assert bool(jnp.allclose(logits, ref, rtol=1e-2, atol=1e-2)), \
        float(jnp.max(jnp.abs(logits - ref)))

    print("KERNEL_OK")
</pallas_src>

<mosaic_0001>
module attributes {stable_mosaic.version = 11 : i64} {
  func.func @_rmsnorm_matmul_kernel(%arg0: i32, %arg1: i32, %arg2: memref<16x64xf32, #tpu.memory_space<vmem>>, %arg3: memref<1x64xf32, #tpu.memory_space<vmem>>, %arg4: memref<64x128xf32, #tpu.memory_space<vmem>>, %arg5: memref<16x128xf32, #tpu.memory_space<vmem>>) attributes {dimension_semantics = [#tpu.dimension_semantics<parallel>, #tpu.dimension_semantics<parallel>], iteration_bounds = array<i64: 1, 1>, scalar_prefetch = 0 : i64, scratch_operands = 0 : i64, tpu.core_type = #tpu.core_type<tc>, window_params = [{transform_indices = @transform_0, window_bounds = array<i64: 16, 64>}, {pipeline_mode = #tpu.pipeline_mode<synchronous>, transform_indices = @transform_1, window_bounds = array<i64: 1, 64>}, {transform_indices = @transform_2, window_bounds = array<i64: 64, 128>}, {transform_indices = @transform_3, window_bounds = array<i64: 16, 128>}]} {
    %c0 = arith.constant 0 : index
    %c0_0 = arith.constant 0 : index
    %0 = vector.load %arg2[%c0, %c0_0] : memref<16x64xf32, #tpu.memory_space<vmem>>, vector<16x64xf32>
    %1 = arith.mulf %0, %0 : vector<16x64xf32>
    %cst = arith.constant dense<0.000000e+00> : vector<16xf32>
    %2 = vector.multi_reduction <add>, %1, %cst [1] : vector<16x64xf32> to vector<16xf32>
    %3 = vector.shape_cast %2 : vector<16xf32> to vector<16x1xf32>
    %cst_1 = arith.constant 6.400000e+01 : f32
    %4 = vector.broadcast %cst_1 : f32 to vector<16x1xf32>
    %5 = arith.divf %3, %4 : vector<16x1xf32>
    %cst_2 = arith.constant 9.99999974E-6 : f32
    %6 = vector.broadcast %cst_2 : f32 to vector<16x1xf32>
    %7 = arith.addf %5, %6 : vector<16x1xf32>
    %8 = math.rsqrt %7 : vector<16x1xf32>
    %9 = vector.broadcast %8 : vector<16x1xf32> to vector<16x64xf32>
    %10 = arith.mulf %0, %9 : vector<16x64xf32>
    %c0_3 = arith.constant 0 : index
    %c0_4 = arith.constant 0 : index
    %11 = vector.load %arg3[%c0_3, %c0_4] : memref<1x64xf32, #tpu.memory_space<vmem>>, vector<1x64xf32>
    %12 = vector.broadcast %11 : vector<1x64xf32> to vector<16x64xf32>
    %13 = arith.mulf %10, %12 : vector<16x64xf32>
    %c0_5 = arith.constant 0 : index
    %c0_6 = arith.constant 0 : index
    %14 = vector.load %arg4[%c0_5, %c0_6] : memref<64x128xf32, #tpu.memory_space<vmem>>, vector<64x128xf32>
    %cst_7 = arith.constant dense<0.000000e+00> : vector<16x128xf32>
    %15 = tpu.matmul %13, %14, %cst_7 {dimension_numbers = #tpu.dot_dimension_numbers<[1], [0], [0], [1], [0, 0, 1, 1], [], []>} : vector<16x64xf32>, vector<64x128xf32>, vector<16x128xf32> -> vector<16x128xf32>
    %c0_8 = arith.constant 0 : index
    %c0_9 = arith.constant 0 : index
    %16 = vector.load %arg5[%c0_8, %c0_9] : memref<16x128xf32, #tpu.memory_space<vmem>>, vector<16x128xf32>
    tpu.vector_store %arg5[%c0_8, %c0_9], %15 {strides = array<i32>} : memref<16x128xf32, #tpu.memory_space<vmem>>, vector<16x128xf32>,
    return
  }
  func.func @transform_0(%arg0: i32, %arg1: i32) -> (i32, i32) {
    %c0_i32 = arith.constant 0 : i32
    %c0_i32_0 = arith.constant 0 : i32
    return %arg0, %c0_i32 : i32, i32
  }
  func.func @transform_1(%arg0: i32, %arg1: i32) -> (i32, i32) {
    %c0_i32 = arith.constant 0 : i32
    %c0_i32_0 = arith.constant 0 : i32
    %c0_i32_1 = arith.constant 0 : i32
    return %c0_i32, %c0_i32_0 : i32, i32
  }
  func.func @transform_2(%arg0: i32, %arg1: i32) -> (i32, i32) {
    %c0_i32 = arith.constant 0 : i32
    %c0_i32_0 = arith.constant 0 : i32
    return %c0_i32, %arg1 : i32, i32
  }
  func.func @transform_3(%arg0: i32, %arg1: i32) -> (i32, i32) {
    %c0_i32 = arith.constant 0 : i32
    return %arg0, %arg1 : i32, i32
  }
}

</mosaic_0001>

<bundles_post_ra>
// kernel: tpu_custom_call.1
= control target key start
LH: loop header
LB: loop body
LE: loop exit
PB: predicated region body
PF: predicated region fallthrough
CT: control target
= control target key end

     0   :  { %8 = vsyncpa [#allocation3], 0  ;;  %s387_s0 = inlined_call_operand.hbm [shape: f32[16,64], index: 0, kind: input, shape index: {}]   ;;  %s388_s1 = inlined_call_operand.vmem [shape: f32[1,64], index: 1, kind: input, shape index: {}]   ;;  %s389_s2 = inlined_call_operand.hbm [shape: f32[64,128], index: 2, kind: input, shape index: {}]   ;;  %s390_s3 = inlined_call_operand.hbm [shape: f32[16,128], index: 3, kind: output, shape index: {}]  }
   0x1   :  { %9 = vsyncpa [#allocation6], 0 }
   0x2   :  { %10 = vsyncpa [#allocation4], 0  ;;  %s310_s12 = smov [#allocation2]   ;;  %s238_s16 = scalar_lea.hbm %s387_s0, 256 }
   0x3   :  { %s16_s13 = sshll.u32 %s310_s12, 4  ;;  %p239_p0 = scmp.ne.s32.totalorder %s387_s0, %s238_s16  ;;  %s17_s13 = int_to_ptr.vmem [resolvable:$true] %s16_s13 }
   0x4   :  { %p242_p1 = scmp.lt.u32.totalorder %s238_s16, %s387_s0 }
   0x6   :  { %p244_p2 = pnand %p242_p1, %p239_p0 }
   0x8   :  { %247 = shalt.err (!%p244_p2)
}
   0x9   :  { %s248_s21 = scalar_lea.vmem %s17_s13, 256  ;;  %p253_p4 = scmp.lt.s32.totalorder %s17_s13, %s17_s13 }
   0xa   :  { %p249_p3 = scmp.ne.s32.totalorder %s17_s13, %s248_s21  ;;  %p254_p5 = scmp.lt.s32.totalorder %s248_s21, %s248_s21 }
   0xc   :  { %p255_p6 = por %p254_p5, %p253_p4 }
   0xe   :  { %p256_p7 = pnand %p255_p6, %p249_p3 }
  0x10   :  { %259 = shalt.err (!%p256_p7)
}
  0x11   :  { %s311_s22 = smov 128   ;;  %s312_s23 = smov 8  }
  0x12   :  { %22 = dma.hbm_to_vmem [thread:$0]  %s387_s0, 256, %s17_s13, [#allocation3], %s311_s22, %s311_s22, %s312_s23  }
  0x13   :  { %s313_s26 = smov [#allocation5]   ;;  %s260_s30 = scalar_lea.hbm %s389_s2, 1024 }
  0x14   :  { %s30_s27 = sshll.u32 %s313_s26, 4  ;;  %p261_p8 = scmp.ne.s32.totalorder %s389_s2, %s260_s30  ;;  %s31_s27 = int_to_ptr.vmem [resolvable:$true] %s30_s27 }
  0x15   :  { %p264_p9 = scmp.lt.u32.totalorder %s260_s30, %s389_s2 }
  0x17   :  { %p266_p10 = pnand %p264_p9, %p261_p8 }
  0x19   :  { %269 = shalt.err (!%p266_p10)
}
  0x1a   :  { %s270_s8 = scalar_lea.vmem %s31_s27, 1024  ;;  %p275_p12 = scmp.lt.s32.totalorder %s31_s27, %s31_s27 }
  0x1b   :  { %p271_p11 = scmp.ne.s32.totalorder %s31_s27, %s270_s8  ;;  %p276_p13 = scmp.lt.s32.totalorder %s270_s8, %s270_s8 }
  0x1d   :  { %p277_p0 = por %p276_p13, %p275_p12 }
  0x1f   :  { %p278_p1 = pnand %p277_p0, %p271_p11 }
  0x21   :  { %281 = shalt.err (!%p278_p1)
}
  0x22   :  { %36 = dma.hbm_to_vmem [thread:$0]  %s389_s2, 1024, %s31_s27, [#allocation6], %s311_s22, %s311_s22, %s312_s23  }
  0x23   :  { %304 = dma.done.wait [#allocation3], 256  }
  0x24   :  { %305 = vsyncadd [#allocation3], 4294967040 }
  0x25   :  { %306 = dma.done.wait [#allocation6], 1024  }
  0x26   :  { %307 = vsyncadd [#allocation6], 4294966272  ;;  %v43_v0 = vld [vmem:[#allocation2] sm:$0xff]  ;;  %vm47_vm0 = vcmask 523264   ;;  %v44_v1 = vld [vmem:[#allocation2 + $0x8] sm:$0xff]  ;;  %s314_s11 = smov [#allocation7]  }
  0x27   :  { %v45_v2 = vmul.f32 %v43_v0, %v43_v0  ;;  %v46_v3 = vmul.f32 %v44_v1, %v44_v1  ;;  %v72_v6 = vld [vmem:[#allocation5] sm:$0xff]  ;;  %v73_v7 = vld [vmem:[#allocation5 + $0x8] sm:$0xff]  ;;  %v74_v9 = vld [vmem:[#allocation5 + $0x10] sm:$0xff]  ;;  %s168_s12 = sshll.u32 %s314_s11, 4  ;;  %s169_s12 = int_to_ptr.vmem [resolvable:$true] %s168_s12 }
  0x28   :  { %v213_v8 = vpack.c.bf16 %v73_v7, %v72_v6  ;;  %v75_v10 = vld [vmem:[#allocation5 + $0x18] sm:$0xff]  ;;  %v76_v11 = vld [vmem:[#allocation5 + $0x20] sm:$0xff]  ;;  %v77_v13 = vld [vmem:[#allocation5 + $0x28] sm:$0xff]  ;;  %s282_s13 = scalar_lea.vmem %s169_s12, 256  ;;  %p287_p3 = scmp.lt.s32.totalorder %s169_s12, %s169_s12 }
  0x29   :  { %v48_v4 = vsel %vm47_vm0, %v45_v2, 0.0  ;;  %v51_v5 = vsel %vm47_vm0, %v46_v3, 0.0  ;;  %v217_v12 = vpack.c.bf16 %v75_v10, %v74_v9  ;;  %v221_v14 = vpack.c.bf16 %v77_v13, %v76_v11  ;;  %v78_v15 = vld [vmem:[#allocation5 + $0x30] sm:$0xff]  ;;  %v79_v16 = vld [vmem:[#allocation5 + $0x38] sm:$0xff]  ;;  %p283_p2 = scmp.ne.s32.totalorder %s169_s12, %s282_s13  ;;  %p288_p4 = scmp.lt.s32.totalorder %s282_s13, %s282_s13 }
  0x2a   :  { %49 = vadd.xlane.f32.xlu0 %v48_v4  ;;  %214 = vmatprep.subr.bf16.mxu0 %v213_v8  ;;  %v225_v17 = vpack.c.bf16 %v79_v16, %v78_v15  ;;  %v181_v25 = vld [vmem:[%s388_s1] ss:$0 sm:$0xff] }
  0x2b   :  { %216 = vmatpush3.bf16.msra.mxu0 %v213_v8  ;;  %p289_p5 = por %p288_p4, %p287_p3 }
  0x2c   :  { %218 = vmatprep.subr.bf16.mxu0 %v217_v12 }
  0x2d   :  { %p290_p6 = pnand %p289_p5, %p283_p2 }
  0x2e   :  { %52 = vadd.xlane.f32.xlu0 %v51_v5 }
  0x2f   :  { %220 = vmatpush3.bf16.msra.mxu0 %v217_v12 }
  0x30   :  { %222 = vmatprep.subr.bf16.mxu0 %v221_v14 }
  0x33   :  { %224 = vmatpush3.bf16.msra.mxu0 %v221_v14 }
  0x34   :  { %226 = vmatprep.subr.bf16.mxu0 %v225_v17 }
  0x37   :  { %228 = vmatpush3.bf16.msra.mxu0 %v225_v17 }
  0xb7   :  { %v50_v18 = vpop.xlane.xlu0 %49 }
  0xb8   :  { %v55_v19 = vmul.f32 0.015625, %v50_v18 }
  0xba   :  { %v57_v20 = vadd.f32 1e-05, %v55_v19 }
  0xbb   :  { %v53_v21 = vpop.xlane.xlu0 %52 }
  0xbc   :  { %234 = vrsqrt.f32 %v57_v20  ;;  %v56_v22 = vmul.f32 0.015625, %v53_v21 }
  0xbe   :  { %v58_v23 = vadd.f32 1e-05, %v56_v22 }
  0xc0   :  { %236 = vrsqrt.f32 %v58_v23 }
  0xc6   :  { %v235_v24 = vpop.eup %234 }
  0xc7   :  { %v61_v26 = vmul.f32 %v235_v24, %v43_v0 }
  0xc9   :  { %v70_v27 = vmul.f32 %v181_v25, %v61_v26 }
  0xca   :  { %v237_v28 = vpop.eup %236 }
  0xcb   :  { %v62_v29 = vmul.f32 %v237_v28, %v44_v1  ;;  %210 = vmatprep.mubr.msk.f32.mxu0 %vm47_vm0, %v70_v27 }
  0xcd   :  { %v71_v30 = vmul.f32 %v181_v25, %v62_v29 }
  0xcf   :  { %211 = vmatmul.mubr.msk.f32.vlgmr.msra.gmra.mrb[0].mxu0 %vm47_vm0, %v71_v30 }
 0x1a2   :  { %v212_v31 = vpop.f32.mrb[0].mxu0 }
 0x1a3   :  { %162 = vst [vmem:[#allocation7 + $0x8] sm:$0xff] %v212_v31  ;;  %v152_v32 = vpop.f32.mrb[1].mxu0 }
 0x1a4   :  { %161 = vst [vmem:[#allocation7] sm:$0xff] %v152_v32 }
 0x1a5   :  { %293 = shalt.err (!%p290_p6)
}
 0x1a6   :  { %s294_s15 = scalar_lea.hbm %s390_s3, 256 }
 0x1a7   :  { %p295_p7 = scmp.ne.s32.totalorder %s390_s3, %s294_s15  ;;  %p298_p8 = scmp.lt.u32.totalorder %s294_s15, %s390_s3 }
 0x1a9   :  { %p300_p9 = pnand %p298_p8, %p295_p7 }
 0x1ab   :  { %303 = shalt.err (!%p300_p9)
}
 0x1ac   :  { %174 = dma.vmem_to_hbm [thread:$0]  %s169_s12, 256, %s390_s3, [#allocation4], %s311_s22, %s311_s22, %s312_s23  }
 0x1ad   :  { %308 = dma.done.wait [#allocation4], 256  }
 0x1ae   :  { %309 = vsyncadd [#allocation4], 4294967040 }
 0x1af   :  { %178 = vsyncpa [#allocation3], 1 }
 0x1b0   :  { %179 = vsyncpa [#allocation6], 1 }
 0x1b1   :  { %180 = vsyncpa [#allocation4], 1 }

</bundles_post_ra>
